<compile_context>
chip_gen: v7x
topology: tpu7x:2x2x1
jax: 0.10.0
libtpu: 0.0.40
codegen_flags: <defaults>
</compile_context>

<pallas_src>
import jax
import jax.numpy as jnp
from jax.experimental import pallas as pl
from jax.experimental.pallas import tpu as pltpu

LANES = 128                              # vreg lane width; last dim of the slab
_TARGET_BLOCK_BYTES = 2 * 1024 * 1024    # ~2 MiB blocks => near HBM roofline


def _hrelu_math_f32(xf):
    """HReLU in f32: sqrt(1+x^2)+x, numerically stable branch for x<0."""
    s = jnp.sqrt(1.0 + xf * xf)
    return jnp.where(xf < 0.0, 1.0 / (s - xf), s + xf)


def _hrelu_kernel(x_ref, o_ref):
    # f32 compute: the kernel is HBM-bound, so the upcast is free and keeps
    # full accuracy for bf16 inputs as well.
    xf = x_ref[...].astype(jnp.float32)
    o_ref[...] = _hrelu_math_f32(xf).astype(o_ref.dtype)


def _sublane_pack(dtype) -> int:
    """Sublane packing factor: 8 (f32), 16 (bf16/f16), 32 (int8/fp8)."""
    itemsize = jnp.dtype(dtype).itemsize
    return max(8, 32 // max(itemsize, 1))


def _round_up(v: int, m: int) -> int:
    return -(-v // m) * m


def _choose_tile_rows(rows: int, dtype) -> int:
    pack = _sublane_pack(dtype)
    itemsize = jnp.dtype(dtype).itemsize
    target = max(pack, _TARGET_BLOCK_BYTES // (LANES * itemsize))
    tr = _round_up(min(target, rows), pack)
    # v7x has 2 TensorCores per chip: give the 'parallel' grid axis at least
    # 2 steps whenever the slab is big enough to split.
    if pl.cdiv(rows, tr) < 2 and rows > pack:
        tr = _round_up(pl.cdiv(rows, 2), pack)
    return tr


def _hrelu_pallas_2d(x2d: jax.Array) -> jax.Array:
    rows, lanes = x2d.shape
    assert lanes == LANES
    tr = _choose_tile_rows(rows, x2d.dtype)
    grid = (pl.cdiv(rows, tr),)          # ragged last block handled by Pallas
    n = rows * LANES
    itemsize = jnp.dtype(x2d.dtype).itemsize
    return pl.pallas_call(
        _hrelu_kernel,
        out_shape=jax.ShapeDtypeStruct((rows, LANES), x2d.dtype),
        grid_spec=pltpu.PrefetchScalarGridSpec(
            num_scalar_prefetch=0,
            grid=grid,
            in_specs=[pl.BlockSpec((tr, LANES), lambda i: (i, 0))],
            out_specs=pl.BlockSpec((tr, LANES), lambda i: (i, 0)),
        ),
        compiler_params=pltpu.CompilerParams(
            dimension_semantics=("parallel",),
        ),
        cost_estimate=pl.CostEstimate(
            flops=3 * n,
            transcendentals=n,
            bytes_accessed=2 * n * itemsize,
        ),
    )(x2d)


def _hrelu_xla(x: jax.Array) -> jax.Array:
    """Plain-XLA fallback for tiny tensors / sub-lane-width tails."""
    return _hrelu_math_f32(x.astype(jnp.float32)).astype(x.dtype)


def hrelu(x: jax.Array) -> jax.Array:
    """Elementwise HReLU via a Pallas TPU kernel; accepts any shape/dtype."""
    orig_shape = x.shape
    n = x.size
    pack = _sublane_pack(x.dtype)
    if n < pack * LANES:                 # smaller than one minimal tile
        return _hrelu_xla(x)

    x_flat = x.reshape(-1)               # contiguous reshape: no HBM copy
    n_bulk = (n // LANES) * LANES        # lane-aligned bulk for the kernel

    bulk = x_flat if n_bulk == n else x_flat[:n_bulk]
    out_bulk = _hrelu_pallas_2d(bulk.reshape(n_bulk // LANES, LANES))

    if n_bulk == n:
        return out_bulk.reshape(orig_shape)

    # Rare sub-128-element tail: compute with plain XLA instead of paying a
    # full pad-concatenate + slice HBM round trip over the whole tensor.
    tail = _hrelu_xla(x_flat[n_bulk:])
    return jnp.concatenate([out_bulk.reshape(-1), tail]).reshape(orig_shape)


if __name__ == "__main__":
    key = jax.random.PRNGKey(0)
    k_ragged, k_bf16 = jax.random.split(key)

    # Primary check: NCHW f32 input (lane-aligned fast path, 2 grid steps).
    x = jax.random.normal(key, (2, 4, 16, 16), dtype=jnp.float32)
    y = jax.block_until_ready(hrelu(x))
    y_ref = jnp.sqrt(1.0 + jnp.square(x)) + x
    assert y.shape == x.shape and y.dtype == x.dtype
    assert jnp.allclose(y, y_ref, atol=1e-5, rtol=1e-5)

    # Ragged shape: exercises the pl.cdiv grid (partial last block) + XLA tail.
    x2 = jax.random.normal(k_ragged, (3, 5, 7, 11), dtype=jnp.float32)
    y2 = jax.block_until_ready(hrelu(x2))
    y2_ref = jnp.sqrt(1.0 + jnp.square(x2)) + x2
    assert y2.shape == x2.shape and y2.dtype == x2.dtype
    assert jnp.allclose(y2, y2_ref, atol=1e-5, rtol=1e-5)

    # bf16: exercises dtype-aware (16-row) sublane packing.
    x3 = jax.random.normal(k_bf16, (2, 8, 16, 16), dtype=jnp.bfloat16)
    y3 = jax.block_until_ready(hrelu(x3))
    x3f = x3.astype(jnp.float32)
    y3_ref = jnp.sqrt(1.0 + jnp.square(x3f)) + x3f
    assert y3.shape == x3.shape and y3.dtype == jnp.bfloat16
    assert jnp.allclose(y3.astype(jnp.float32), y3_ref, atol=2e-2, rtol=2e-2)

    print("KERNEL_OK")
</pallas_src>

<mosaic_0001>
module attributes {stable_mosaic.version = 11 : i64} {
  func.func @_hrelu_kernel(%arg0: i32, %arg1: memref<8x128xf32, #tpu.memory_space<vmem>>, %arg2: memref<8x128xf32, #tpu.memory_space<vmem>>) attributes {dimension_semantics = [#tpu.dimension_semantics<parallel>], iteration_bounds = array<i64: 2>, scalar_prefetch = 0 : i64, scratch_operands = 0 : i64, tpu.core_type = #tpu.core_type<tc>, window_params = [{transform_indices = @transform_0, window_bounds = array<i64: 8, 128>}, {transform_indices = @transform_1, window_bounds = array<i64: 8, 128>}]} {
    %c0 = arith.constant 0 : index
    %c0_0 = arith.constant 0 : index
    %0 = vector.load %arg1[%c0, %c0_0] : memref<8x128xf32, #tpu.memory_space<vmem>>, vector<8x128xf32>
    %1 = arith.mulf %0, %0 : vector<8x128xf32>
    %cst = arith.constant 1.000000e+00 : f32
    %2 = vector.broadcast %cst : f32 to vector<8x128xf32>
    %3 = arith.addf %2, %1 : vector<8x128xf32>
    %4 = math.sqrt %3 : vector<8x128xf32>
    %cst_1 = arith.constant 0.000000e+00 : f32
    %5 = vector.broadcast %cst_1 : f32 to vector<8x128xf32>
    %6 = arith.cmpf olt, %0, %5 : vector<8x128xf32>
    %7 = arith.subf %4, %0 : vector<8x128xf32>
    %cst_2 = arith.constant 1.000000e+00 : f32
    %8 = vector.broadcast %cst_2 : f32 to vector<8x128xf32>
    %9 = arith.divf %8, %7 : vector<8x128xf32>
    %10 = arith.addf %4, %0 : vector<8x128xf32>
    %11 = arith.select %6, %9, %10 : vector<8x128xi1>, vector<8x128xf32>
    %c0_3 = arith.constant 0 : index
    %c0_4 = arith.constant 0 : index
    %12 = vector.load %arg2[%c0_3, %c0_4] : memref<8x128xf32, #tpu.memory_space<vmem>>, vector<8x128xf32>
    tpu.vector_store %arg2[%c0_3, %c0_4], %11 {strides = array<i32>} : memref<8x128xf32, #tpu.memory_space<vmem>>, vector<8x128xf32>,
    return
  }
  func.func @transform_0(%arg0: i32) -> (i32, i32) {
    %c0_i32 = arith.constant 0 : i32
    %c0_i32_0 = arith.constant 0 : i32
    return %arg0, %c0_i32 : i32, i32
  }
  func.func @transform_1(%arg0: i32) -> (i32, i32) {
    %c0_i32 = arith.constant 0 : i32
    %c0_i32_0 = arith.constant 0 : i32
    return %arg0, %c0_i32 : i32, i32
  }
}

</mosaic_0001>

<bundles_post_ra>
// kernel: tpu_custom_call.1
= control target key start
LH: loop header
LB: loop body
LE: loop exit
PB: predicated region body
PF: predicated region fallthrough
CT: control target
= control target key end

     0   :  { %6 = vsyncpa [#allocation3], 0  ;;  %s566_s0 = inlined_call_operand.hbm [shape: f32[16,128], index: 0, kind: input, shape index: {}]   ;;  %s567_s1 = inlined_call_operand.hbm [shape: f32[16,128], index: 1, kind: output, shape index: {}]  }
   0x1   :  { %8 = vsyncpa [#allocation3 + $0x1], 0 }
   0x2   :  { %9 = vsyncpa [#allocation4], 0 }
   0x3   :  { %11 = vsyncpa [#allocation4 + $0x1], 0  ;;  %s405_s6 = smov 0   ;;  %s407_s7 = smov 0  }
   0x4   :  { %s409_s8 = smov 0   ;;  %s411_s9 = smov 0  }
   0x5 LB: > { %s426_s10 = sadd.s32 4294967295, %s391_s9   ;;  %s233_s11 = sadd.s32 4294967294, %s391_s9   ;;  %s391_s9 = sphi %s411_s9, %s582_s9   ;;  %s387_s8 = sphi %s409_s8, %s581_s8   ;;  %s383_s7 = sphi %s407_s7, %s580_s7   ;;  %s379_s6 = sphi %s405_s6, %s579_s6  }
   0x6   : > { %s430_s12 = sadd.s32 1, %s391_s9   ;;  %s24_s13 = sadd.s32 1, %s387_s8 }
   0x7   : > { %s21_s14 = ssub.s32 %s391_s9, %s430_s12  ;;  %p31_p0 = scmp.ne.s32.totalorder %s387_s8, %s383_s7 }
   0x8   : > { %p22_p1 = scmp.eq.s32.totalorder %s21_s14, 0  ;;  %p32_p2 = scmp.eq.s32.totalorder %s391_s9, 0 }
   0x9   : > { %p37_p3 = scmp.ne.s32.totalorder %s383_s7, %s379_s6  ;;  %p38_p4 = scmp.eq.s32.totalorder %s426_s10, 0 }
   0xa   : > { %s442_s15 = scalar_select %p22_p1, %s387_s8, %s24_s13  }
   0xb   : > { %p444_p5 = por %p32_p2, %p31_p0  ;;  %p448_p6 = por %p38_p4, %p37_p3 }
   0xc   : > { %p61_p7 = scmp.eq.s32.totalorder %s426_s10, 1  ;;  %p67_p8 = scmp.eq.s32.totalorder %s233_s11, 1 }
   0xd   : > { %p257_p10 = scmp.lt.s32.totalorder %s391_s9, 2  ;;  %s87_s20 = sand.u32 1, %s387_s8  }
   0xe   : > { %p455_p11 = por %p61_p7, %p31_p0  ;;  %p459_p12 = por %p67_p8, %p37_p3 }
   0xf   : > { %s237_s21 = sshll.u32 %s391_s9, 7  ;;  %s236_s22 = sshll.u32 %s87_s20, 3 }
  0x10   : > { %s571_s18 = scalar_select %p455_p11, 1, 0 }
  0x11   : > { %s572_s19 = scalar_select %p459_p12, 1, 0 }
  0x12   : > { %s468_s25 = scalar_lea.hbm %s566_s0, %s237_s21  ;;  %s91_s26 = scalar_lea.vmem [#allocation2], %s236_s22 }
  0x13   : > { %s98_s27 = sshll.u32 %s91_s26, 4  ;;  %p472_p13 = pnand %p257_p10, %p444_p5  ;;  %s476_s27 = int_to_ptr.vmem [resolvable:$true] %s98_s27 }
  0x14   : > { %s88_s29 = scalar_lea.sflag [#allocation3], %s87_s20  ;;  %s295_s30 = scalar_lea.hbm %s468_s25, 128 }
  0x15   : > { %p296_p2 = scmp.ne.s32.totalorder %s468_s25, %s295_s30  ;;  %p297_p3 = pneg %p472_p13 }
  0x16   : > { %s300_s4 = scalar_lea.hbm %s566_s0, 256  ;;  %p301_p5 = scmp.lt.u32.totalorder %s468_s25, %s566_s0 }
  0x17   : > { %p298_p4 = pnand %p297_p3, %p296_p2  ;;  %p302_p8 = scmp.lt.u32.totalorder %s300_s4, %s295_s30 }
  0x18   : > { %p304_p9 = scmp.lt.u32.totalorder %s295_s30, %s468_s25 }
  0x19   : > { %p299_p7 = pneg %p298_p4  ;;  %p303_p10 = por %p302_p8, %p301_p5 }
  0x1b   : > { %p305_p0 = por %p304_p9, %p303_p10 }
  0x1d   : > { %p306_p1 = pnand %p305_p0, %p299_p7 }
  0x1f   : > { %309 = shalt.err (!%p306_p1)
}
  0x20   : > { %s310_s13 = scalar_lea.vmem %s476_s27, 128  ;;  %s393_s14 = smov [#allocation2]  }
  0x21   : > { %p311_p2 = scmp.ne.s32.totalorder %s476_s27, %s310_s13  ;;  %s315_s16 = sshll.u32 %s393_s14, 4  ;;  %s316_s16 = int_to_ptr.vmem [resolvable:$false] %s315_s16 }
  0x22   : > { %s317_s20 = scalar_lea.vmem %s316_s16, 256  ;;  %p318_p11 = scmp.lt.s32.totalorder %s476_s27, %s316_s16 }
  0x23   : > { %p313_p4 = pnand %p311_p2, %p297_p3  ;;  %p319_p5 = scmp.lt.s32.totalorder %s317_s20, %s310_s13 }
  0x25   : > { %p314_p12 = pneg %p313_p4  ;;  %p320_p8 = por %p319_p5, %p318_p11 }
  0x27   : > { %p321_p9 = pnand %p320_p8, %p314_p12 }
  0x29   : > { %324 = shalt.err (!%p321_p9)
}
  0x2a   : > { %252 = dma.hbm_to_vmem [thread:$0]  (!%p472_p13), %s468_s25, 128, %s476_s27, %s88_s29  }
  0x2b   : > { %p574_p0 = scmp.lt.s32.totalorder %s391_s9, 3  ;;  %p575_p1 = scmp.ge.s32.totalorder %s391_s9, 1 }
  0x2d   : > { %p104_p3 = pnand %p575_p1, %p574_p0 }
  0x2e   : > { %s510_s21 = sand.u32 (!%p104_p3), 1, %s383_s7  }
  0x2f   : > { %107 = sbr.rel (%p104_p3) target bundleno = 103 (0x67), region = 24  ;;  %s239_s22 = sshll.u32 (!%p104_p3), %s510_s21, 3 }
  0x30   : > { %s110_s23 = scalar_lea.sflag (!%p104_p3), [#allocation3], %s510_s21  ;;  %s113_s24 = scalar_lea.vmem (!%p104_p3), [#allocation2], %s239_s22 }
  0x36   : > { %370 = dma.done.wait (%p448_p6), %s110_s23, 128  }
  0x37   : > { %372 = vsyncadd (%p448_p6), %s110_s23, 4294967168  ;;  %v132_v0 = vld [vmem:[%s113_s24] sm:$0xff]  ;;  %s131_s25 = scalar_lea.vmem [#allocation5], %s239_s22  ;;  %s242_s26 = sshll.u32 %s426_s10, 7 }
  0x38   : > { %v133_v1 = vmul.f32 %v132_v0, %v132_v0  ;;  %s163_s17 = sshll.u32 %s131_s25, 4  ;;  %vm142_vm2 = vcmp.lt.f32.partialorder %v132_v0, 0.0  ;;  %s524_s29 = scalar_lea.hbm %s567_s1, %s242_s26  ;;  %s519_s17 = int_to_ptr.vmem [resolvable:$true] %s163_s17 }
  0x39   : > { %s150_s30 = scalar_lea.sflag [#allocation4], %s510_s21  ;;  %s325_s2 = scalar_lea.vmem %s519_s17, 128 }
  0x3a   : > { %v134_v2 = vadd.f32 1.0, %v133_v1  ;;  %p326_p6 = scmp.ne.s32.totalorder %s519_s17, %s325_s2  ;;  %p576_p11 = scmp.ne.s32.totalorder %s571_s18, 0 }
  0x3b   : > { %s394_s10 = smov [#allocation5]  }
  0x3c   : > { %291 = vrsqrt.f32 %v134_v2  ;;  %vm137_vm0 = vcmp.eq.f32.partialorder %v134_v2, inf  ;;  %v140_v4 = vand.u32 2147483648, %v134_v2  ;;  %vm139_vm1 = vcmp.eq.f32.partialorder %v134_v2, 0.0  ;;  %p327_p12 = pnand %p326_p6, %p576_p11  ;;  %s329_s3 = sshll.u32 %s394_s10, 4  ;;  %s330_s3 = int_to_ptr.vmem [resolvable:$false] %s329_s3 }
  0x3d   : > { %s331_s4 = scalar_lea.vmem %s330_s3, 256  ;;  %p332_p7 = scmp.lt.s32.totalorder %s519_s17, %s330_s3 }
  0x3e   : > { %p328_p13 = pneg %p327_p12  ;;  %p333_p10 = scmp.lt.s32.totalorder %s331_s4, %s325_s2 }
  0x40   : > { %p334_p2 = por %p333_p10, %p332_p7 }
  0x42   : > { %p335_p4 = pnand %p334_p2, %p328_p13 }
  0x46   : > { %v292_v3 = vpop.eup %291 }
  0x47   : > { %v136_v5 = vmul.f32 %v292_v3, %v134_v2 }
  0x49   : > { %v138_v6 = vsel %vm137_vm0, %v134_v2, %v136_v5 }
  0x4a   : > { %v141_v7 = vsel %vm139_vm1, %v140_v4, %v138_v6 }
  0x4b   : > { %v143_v8 = vsub.f32 %v141_v7, %v132_v0  ;;  %v146_v9 = vadd.f32 %v141_v7, %v132_v0 }
  0x4d   : > { %293 = vrcp.f32 %v143_v8 }
  0x57   : > { %v294_v10 = vpop.eup %293 }
  0x58   : > { %v147_v11 = vsel %vm142_vm2, %v294_v10, %v146_v9 }
  0x59   : > { %148 = vst [vmem:[%s131_s25] sm:$0xff] %v147_v11 }
  0x5a   : > { %338 = shalt.err (!%p335_p4)
}
  0x5b   : > { %s339_s5 = scalar_lea.hbm %s524_s29, 128  ;;  %s343_s14 = scalar_lea.hbm %s567_s1, 256 }
  0x5c   : > { %p340_p5 = scmp.ne.s32.totalorder %s524_s29, %s339_s5  ;;  %p344_p0 = scmp.lt.u32.totalorder %s524_s29, %s567_s1 }
  0x5d   : > { %p345_p1 = scmp.lt.u32.totalorder %s343_s14, %s339_s5  ;;  %p347_p6 = scmp.lt.u32.totalorder %s339_s5, %s524_s29 }
  0x5e   : > { %p341_p8 = pnand %p340_p5, %p576_p11 }
  0x5f   : > { %p346_p3 = por %p345_p1, %p344_p0 }
  0x60   : > { %p342_p9 = pneg %p341_p8 }
  0x61   : > { %p348_p12 = por %p347_p6, %p346_p3 }
  0x63   : > { %p349_p13 = pnand %p348_p12, %p342_p9 }
  0x65   : > { %352 = shalt.err (!%p349_p13)
}
  0x66   : > { %247 = dma.vmem_to_hbm [thread:$0]  (%p576_p11), %s519_s17, 128, %s524_s29, %s150_s30  }
  0x67 PF: > { %s175_s21 = sand.u32 1, %s379_s6   ;;  %p577_p7 = scmp.ne.s32.totalorder %s572_s19, 0 }
  0x68   : > { %p578_p10 = scmp.ge.s32.totalorder %s391_s9, 2  ;;  %s176_s22 = scalar_lea.sflag [#allocation4], %s175_s21 }
  0x6a   : > { %p254_p2 = pnand %p578_p10, %p577_p7 }
  0x6c   : > { %374 = dma.done.wait (!%p254_p2), %s176_s22, 128  }
  0x6d   : > { %376 = vsyncadd (!%p254_p2), %s176_s22, 4294967168  ;;  %p14_p4 = scmp.ge.s32.totalorder %s430_s12, 4   ;;  %s579_s6 = smov %s383_s7 }
  0x6e   : > { %s580_s7 = smov %s387_s8  ;;  %s581_s8 = smov %s442_s15 }
  0x6f   : > { %s582_s9 = smov %s430_s12  ;;  %16 = sbr.rel (!%p14_p4) target bundleno = 5 (0x5), region = 69 }
  0x76   :  { %181 = vsyncpa [#allocation3], 1 }
  0x77   :  { %183 = vsyncpa [#allocation3 + $0x1], 1 }
  0x78   :  { %184 = vsyncpa [#allocation4], 1 }
  0x79   :  { %186 = vsyncpa [#allocation4 + $0x1], 1 }

</bundles_post_ra>
